<compile_context>
chip_gen: v7x
topology: tpu7x:2x2x1
jax: 0.10.0
libtpu: 0.0.40
codegen_flags: <defaults>
</compile_context>

<pallas_src>
import jax
import jax.numpy as jnp
from jax import lax
from jax.experimental import pallas as pl
from jax.experimental.pallas import tpu as pltpu


def _add_per_molecule_value_kernel(feat_ref, rank_ref, vals_ref, out_ref):
    tm, n_feat = feat_ref.shape
    n_mol = vals_ref.shape[1]

    ranks = rank_ref[...]                                      # (tm, 1) int32
    mol_ids = lax.broadcasted_iota(jnp.int32, (1, n_mol), 1)   # (1, M)  int32
    vals = vals_ref[...]                                       # (1, M)  out dtype

    # Gather vals[rank(r)] as a one-hot masked sum over the (small) molecule
    # axis.  Exactly one term per row is non-zero, so accumulating in the
    # output dtype is exact (keeps the (tm, M) temp narrow for bf16 features).
    # Rows past the array end (partial last tile) may carry garbage ranks, but
    # whatever they produce is clipped by Pallas on writeback.
    onehot = (ranks == mol_ids).astype(vals.dtype)             # (tm, M) 0/1
    expanded = jnp.sum(vals * onehot, axis=1, keepdims=True)   # (tm, 1)

    # Split stores: keep the F-wide feature copy on its natural lane layout and
    # confine the narrow store to the single trailing column.
    # TODO(synk): for small F the (tm, F+1) output block is lane-padded and the
    # writeback is masked; a lane-dense variant needs either a padded output
    # convention (feature dim rounded to 128, sliced downstream) or a flat
    # row-major output layout.
    out_ref[:, :n_feat] = feat_ref[...].astype(out_ref.dtype)
    out_ref[:, n_feat:] = expanded


def _round_up(x, m):
    return ((x + m - 1) // m) * m


def add_per_molecule_value(per_atom_property_tensor, per_molecule_values,
                           atomic_subsystem_indices, *, block_rows=1024):
    """per_atom_property_tensor: (N, F) float
       per_molecule_values:      (M,)   float
       atomic_subsystem_indices: (N,)   int (atoms grouped per molecule, sorted)
       returns (N, F+1) in promote_types(feature dtype, value dtype)
    """
    n_atoms, n_feat = per_atom_property_tensor.shape
    n_mol = per_molecule_values.shape[0]
    feat_dtype = per_atom_property_tensor.dtype
    # torch.cat promotes to the common dtype; do the same instead of silently
    # down-casting the per-molecule values to the feature dtype.
    out_dtype = jnp.promote_types(feat_dtype, per_molecule_values.dtype)

    # 0-based segment rank of every atom (== rank of its molecule among the
    # sorted unique subsystem indices).  A single O(N) cumsum replaces the
    # sort-based unique + searchsorted prelude and exactly reproduces
    # repeat_interleave(values, counts) for sorted/grouped indices.
    idx = atomic_subsystem_indices.astype(jnp.int32)
    changes = jnp.concatenate(
        [jnp.zeros((1,), jnp.int32), (idx[1:] != idx[:-1]).astype(jnp.int32)])
    ranks = jnp.cumsum(changes).reshape(n_atoms, 1)
    vals = per_molecule_values.astype(out_dtype).reshape(1, n_mol)

    # ---- tile selection: biggest atom tile whose double-buffered, lane-padded
    # blocks fit the chip's real VMEM (64 MiB/TC on v7x, 128 MiB on v5e/v6e).
    fsize = jnp.dtype(feat_dtype).itemsize
    osize = jnp.dtype(out_dtype).itemsize
    lanes = 128
    f_pad = _round_up(max(n_feat, 1), lanes)
    fo_pad = _round_up(n_feat + 1, lanes)
    m_pad = _round_up(n_mol, lanes)
    # VMEM bytes per atom row of the streamed blocks (feature in + rank column
    # in + concatenated out), lane padding included.
    row_bytes = f_pad * fsize + lanes * 4 + fo_pad * osize
    meta_bytes = 2 * 8 * m_pad * osize          # replicated (1, M) value block

    try:
        vmem_cap = int(pltpu.get_tpu_info().vmem_capacity_bytes)
    except Exception:
        vmem_cap = 64 * 1024 * 1024             # conservative (v7x per-core)
    budget = max(8 * 1024 * 1024, vmem_cap - 8 * 1024 * 1024)
    max_rows = max(8, (budget - meta_bytes) // (2 * row_bytes))

    if n_atoms < 1024 and n_atoms <= min(block_rows, max_rows):
        # Small input: one full-extent block; grid-step overhead dominates.
        tm = n_atoms
    else:
        cap = max(8, (min(block_rows, max_rows) // 8) * 8)
        steps = pl.cdiv(n_atoms, cap)
        if steps < 2:
            steps = 2                 # make sure both v7x TensorCores get work
        elif steps % 2 == 1 and steps <= 8:
            steps += 1                # balanced split across the 2 cores
        tm = min(cap, _round_up(pl.cdiv(n_atoms, steps), 8))

    grid = pl.cdiv(n_atoms, tm)

    needed = 2 * tm * row_bytes + meta_bytes + (1 << 20)
    vmem_limit = int(min(budget, max(16 * 1024 * 1024, needed)))

    # Purely memory-bound: read N*F features + N ranks, write N*(F+1).
    bytes_accessed = int(n_atoms * n_feat * fsize + n_atoms * 4
                         + n_atoms * (n_feat + 1) * osize + n_mol * osize)

    # TODO(synk): for very large molecule counts (M >> 512) chunk the molecule
    # axis with PrefetchScalarGridSpec(num_scalar_prefetch=1) and a per-tile
    # molecule-window offset instead of replicating the full (1, M) row.
    out = pl.pallas_call(
        _add_per_molecule_value_kernel,
        out_shape=jax.ShapeDtypeStruct((n_atoms, n_feat + 1), out_dtype),
        grid_spec=pltpu.PrefetchScalarGridSpec(
            num_scalar_prefetch=0,
            grid=(grid,),
            in_specs=[
                pl.BlockSpec((tm, n_feat), lambda i: (i, 0)),
                pl.BlockSpec((tm, 1), lambda i: (i, 0)),
                pl.BlockSpec((1, n_mol), lambda i: (0, 0)),
            ],
            out_specs=pl.BlockSpec((tm, n_feat + 1), lambda i: (i, 0)),
        ),
        compiler_params=pltpu.CompilerParams(
            dimension_semantics=("parallel",),
            vmem_limit_bytes=vmem_limit),
        cost_estimate=pl.CostEstimate(
            flops=2 * n_atoms * n_mol, transcendentals=0,
            bytes_accessed=bytes_accessed),
    )(per_atom_property_tensor, ranks, vals)
    return out


if __name__ == "__main__":
    key = jax.random.PRNGKey(0)
    k1, k2 = jax.random.split(key)

    # 3 molecules, 20 atoms total; atoms grouped per molecule (sorted indices).
    counts = [7, 6, 7]
    n_atoms = sum(counts)
    n_feat = 32
    n_mol = len(counts)
    atomic_subsystem_indices = jnp.concatenate(
        [jnp.full((c,), m, dtype=jnp.int32) for m, c in enumerate(counts)])

    per_atom = jax.random.normal(k1, (n_atoms, n_feat), dtype=jnp.float32)
    per_mol_values = jax.random.normal(k2, (n_mol,), dtype=jnp.float32)

    # Pure-JAX reference (repeat_interleave == gather for sorted indices).
    expanded_ref = per_mol_values[atomic_subsystem_indices][:, None]
    ref = jnp.concatenate([per_atom, expanded_ref], axis=1)

    # Small block_rows to exercise the multi-step grid + partial last tile.
    out = jax.block_until_ready(
        add_per_molecule_value(per_atom, per_mol_values,
                               atomic_subsystem_indices, block_rows=8))
    assert out.shape == (n_atoms, n_feat + 1), out.shape
    assert jnp.allclose(out, ref, atol=1e-6), "mismatch vs reference (tiled)"

    # Also check the default (single-block) path used for small inputs.
    out2 = jax.block_until_ready(
        add_per_molecule_value(per_atom, per_mol_values,
                               atomic_subsystem_indices))
    assert out2.shape == (n_atoms, n_feat + 1), out2.shape
    assert jnp.allclose(out2, ref, atol=1e-6), "mismatch vs reference (1-block)"

    print("KERNEL_OK")
</pallas_src>

<mosaic_0001>
module attributes {stable_mosaic.version = 11 : i64} {
  func.func @_add_per_molecule_value_kernel(%arg0: i32, %arg1: memref<8x32xf32, #tpu.memory_space<vmem>>, %arg2: memref<8x1xi32, #tpu.memory_space<vmem>>, %arg3: memref<1x3xf32, #tpu.memory_space<vmem>>, %arg4: memref<8x33xf32, #tpu.memory_space<vmem>>) attributes {dimension_semantics = [#tpu.dimension_semantics<parallel>], iteration_bounds = array<i64: 3>, scalar_prefetch = 0 : i64, scratch_operands = 0 : i64, tpu.core_type = #tpu.core_type<tc>, window_params = [{transform_indices = @transform_0, window_bounds = array<i64: 8, 32>}, {transform_indices = @transform_1, window_bounds = array<i64: 8, 1>}, {pipeline_mode = #tpu.pipeline_mode<synchronous>, transform_indices = @transform_2, window_bounds = array<i64: 1, 3>}, {transform_indices = @transform_3, window_bounds = array<i64: 8, 33>}]} {
    %c0 = arith.constant 0 : index
    %c0_0 = arith.constant 0 : index
    %0 = vector.load %arg2[%c0, %c0_0] : memref<8x1xi32, #tpu.memory_space<vmem>>, vector<8x1xi32>
    %1 = tpu.iota {dimensions = array<i32: 1>} : vector<1x3xi32>
    %c0_1 = arith.constant 0 : index
    %c0_2 = arith.constant 0 : index
    %2 = vector.load %arg3[%c0_1, %c0_2] : memref<1x3xf32, #tpu.memory_space<vmem>>, vector<1x3xf32>
    %3 = vector.broadcast %0 : vector<8x1xi32> to vector<8x3xi32>
    %4 = vector.broadcast %1 : vector<1x3xi32> to vector<8x3xi32>
    %5 = arith.cmpi eq, %3, %4 : vector<8x3xi32>
    %6 = arith.extui %5 : vector<8x3xi1> to vector<8x3xi32>
    %7 = arith.sitofp %6 : vector<8x3xi32> to vector<8x3xf32>
    %8 = vector.broadcast %2 : vector<1x3xf32> to vector<8x3xf32>
    %9 = arith.mulf %8, %7 : vector<8x3xf32>
    %cst = arith.constant dense<0.000000e+00> : vector<8xf32>
    %10 = vector.multi_reduction <add>, %9, %cst [1] : vector<8x3xf32> to vector<8xf32>
    %11 = vector.shape_cast %10 : vector<8xf32> to vector<8x1xf32>
    %c0_3 = arith.constant 0 : index
    %c0_4 = arith.constant 0 : index
    %12 = vector.load %arg1[%c0_3, %c0_4] : memref<8x32xf32, #tpu.memory_space<vmem>>, vector<8x32xf32>
    %c0_5 = arith.constant 0 : index
    %c0_6 = arith.constant 0 : index
    %13 = vector.load %arg4[%c0_5, %c0_6] : memref<8x33xf32, #tpu.memory_space<vmem>>, vector<8x32xf32>
    tpu.vector_store %arg4[%c0_5, %c0_6], %12 {strides = array<i32>} : memref<8x33xf32, #tpu.memory_space<vmem>>, vector<8x32xf32>,
    %c0_7 = arith.constant 0 : index
    %c32 = arith.constant 32 : index
    %14 = vector.load %arg4[%c0_7, %c32] : memref<8x33xf32, #tpu.memory_space<vmem>>, vector<8x1xf32>
    tpu.vector_store %arg4[%c0_7, %c32], %11 {strides = array<i32>} : memref<8x33xf32, #tpu.memory_space<vmem>>, vector<8x1xf32>,
    return
  }
  func.func @transform_0(%arg0: i32) -> (i32, i32) {
    %c0_i32 = arith.constant 0 : i32
    %c0_i32_0 = arith.constant 0 : i32
    return %arg0, %c0_i32 : i32, i32
  }
  func.func @transform_1(%arg0: i32) -> (i32, i32) {
    %c0_i32 = arith.constant 0 : i32
    %c0_i32_0 = arith.constant 0 : i32
    return %arg0, %c0_i32 : i32, i32
  }
  func.func @transform_2(%arg0: i32) -> (i32, i32) {
    %c0_i32 = arith.constant 0 : i32
    %c0_i32_0 = arith.constant 0 : i32
    %c0_i32_1 = arith.constant 0 : i32
    return %c0_i32, %c0_i32_0 : i32, i32
  }
  func.func @transform_3(%arg0: i32) -> (i32, i32) {
    %c0_i32 = arith.constant 0 : i32
    %c0_i32_0 = arith.constant 0 : i32
    return %arg0, %c0_i32 : i32, i32
  }
}

</mosaic_0001>

<bundles_post_ra>
// kernel: tpu_custom_call.1
= control target key start
LH: loop header
LB: loop body
LE: loop exit
PB: predicated region body
PF: predicated region fallthrough
CT: control target
= control target key end

     0   :  { %8 = vsyncpa [#allocation3], 0  ;;  %s542_s0 = inlined_call_operand.vmem [shape: f32[20,32], index: 0, kind: input, shape index: {}]   ;;  %s543_s1 = inlined_call_operand.vmem [shape: s32[20,1], index: 1, kind: input, shape index: {}]   ;;  %s544_s2 = inlined_call_operand.vmem [shape: f32[1,3], index: 2, kind: input, shape index: {}]   ;;  %s545_s3 = inlined_call_operand.hbm [shape: f32[20,33], index: 3, kind: output, shape index: {}]  }
   0x1   :  { %10 = vsyncpa [#allocation3 + $0x1], 0  ;;  %s436_s12 = smov 0   ;;  %s438_s13 = smov 0  }
   0x2   :  { %s440_s14 = smov 0   ;;  %s442_s15 = smov 0  }
   0x3 LB: > { %s457_s16 = sadd.s32 4294967295, %s411_s15   ;;  %s294_s17 = sadd.s32 4294967294, %s411_s15   ;;  %s411_s15 = sphi %s442_s15, %s551_s15   ;;  %s407_s14 = sphi %s440_s14, %s550_s14   ;;  %s403_s13 = sphi %s438_s13, %s549_s13   ;;  %s399_s12 = sphi %s436_s12, %s548_s12  }
   0x4   : > { %s461_s18 = sadd.s32 1, %s411_s15   ;;  %s96_s19 = sadd.s32 1, %s407_s14 }
   0x5   : > { %s93_s20 = ssub.s32 %s411_s15, %s461_s18  ;;  %p106_p0 = scmp.ne.s32.totalorder %s407_s14, %s403_s13 }
   0x6   : > { %p94_p1 = scmp.eq.s32.totalorder %s93_s20, 0  ;;  %p107_p2 = scmp.eq.s32.totalorder %s457_s16, 2 }
   0x7   : > { %p112_p3 = scmp.ne.s32.totalorder %s403_s13, %s399_s12  ;;  %p113_p4 = scmp.eq.s32.totalorder %s294_s17, 2 }
   0x8   : > { %s472_s21 = scalar_select %p94_p1, %s407_s14, %s96_s19  }
   0x9   : > { %p474_p5 = por %p107_p2, %p106_p0  ;;  %p478_p6 = por %p113_p4, %p112_p3 }
   0xa   : > { %p297_p7 = scmp.ge.s32.totalorder %s411_s15, 1  ;;  %p148_p8 = scmp.lt.s32.totalorder %s411_s15, 4 }
   0xc   : > { %p149_p9 = pnand %p297_p7, %p148_p8 }
   0xd   : > { %p175_p10 = scmp.lt.s32.totalorder (!%p149_p9), %s457_s16, 2  ;;  %v413_v0 = vmov (!%p149_p9), 0   ;;  %v184_v2 = vlaneseq (!%p149_p9)  ;;  %v302_v5 = vld [vmem:[%s544_s2] ss:$0 sm:$0xff] (!%p149_p9)  ;;  %v414_v6 = vmov (!%p149_p9), 0.0   ;;  %vm200_vm1 = vcmask (!%p149_p9), 23552  }
   0xe   : > { %152 = sbr.rel (%p149_p9) target bundleno = 315 (0x13b), region = 32  ;;  %348 = vset.pattern.permute.xlu0 (!%p149_p9), %v413_v0  ;;  %s172_s7 = sand.u32 (!%p149_p9), 1, %s403_s13   ;;  %vm205_vm2 = vcmask (!%p149_p9), 261120   ;;  %vm207_vm3 = vcmask (!%p149_p9), 269568  }
   0xf   : > { %v185_v3 = vand.u32 (!%p149_p9), 127, %v184_v2  ;;  %s298_s8 = sshll.u32 (!%p149_p9), %s172_s7, 3  ;;  %s304_s10 = sshll.u32 (!%p149_p9), %s457_s16, 7 }
  0x10   : > { %s174_s9 = scalar_lea.vmem (!%p149_p9), [#allocation2], %s298_s8  ;;  %s500_s20 = scalar_lea.hbm (!%p149_p9), %s545_s3, %s304_s10 }
  0x11   : > { %s223_s11 = sshll.u32 (!%p149_p9), %s174_s9, 4  ;;  %s502_s11 = int_to_ptr.vmem [resolvable:$true] %s223_s11 }
  0x15   : > { %s176_s24 = scalar_select %p175_p10, %s457_s16, 2 }
  0x16   : > { %s415_s16 = smov [#allocation2]  }
  0x17   : > { %s299_s25 = sshll.u32 %s176_s24, 3  ;;  %s210_s24 = scalar_lea.sflag [#allocation3], %s172_s7 }
  0x18   : > { %s182_s28 = scalar_lea.vmem %s543_s1, %s299_s25  ;;  %s178_s6 = scalar_lea.vmem %s542_s0, %s299_s25 }
  0x19   : > { %v183_v1 = vld [vmem:[%s182_s28] sm:$0xff]  ;;  %s349_s25 = scalar_lea.vmem %s502_s11, 128  ;;  %s353_s26 = sshll.u32 %s415_s16, 4  ;;  %s354_s26 = int_to_ptr.vmem [resolvable:$false] %s353_s26 }
  0x1a   : > { %188 = vperm.xlu0 %348, %v183_v1   ;;  %v204_v10 = vld [vmem:[%s178_s6] sm:$0xff]  ;;  %p350_p11 = scmp.ne.s32.totalorder %s502_s11, %s349_s25  ;;  %s355_s27 = scalar_lea.vmem %s354_s26, 256 }
  0x1b   : > { %206 = vst.msk [vmem:[%s174_s9] sm:$0xff] %vm205_vm2, %v204_v10  ;;  %p356_p0 = scmp.lt.s32.totalorder %s502_s11, %s354_s26  ;;  %p357_p1 = scmp.lt.s32.totalorder %s355_s27, %s349_s25 }
  0x1c   : > { %p351_p12 = pnand %p350_p11, %p474_p5 }
  0x1d   : > { %p358_p2 = por %p357_p1, %p356_p0 }
  0x1e   : > { %p352_p13 = pneg %p351_p12 }
  0x20   : > { %p359_p3 = pnand %p358_p2, %p352_p13 }
  0x99   : > { %v189_v4 = vpop.permute.xlu0 %188 }
  0x9a   : > { %vm190_vm0 = vcmp.eq.s32.totalorder %v189_v4, %v185_v3 }
  0x9b   : > { %v301_v7 = vsel %vm190_vm0, 1.0, %v414_v6 }
  0x9c   : > { %v199_v8 = vmul.f32 %v302_v5, %v301_v7 }
  0x9e   : > { %v201_v9 = vsel %vm200_vm1, %v199_v8, 0.0 }
  0x9f   : > { %202 = vadd.xlane.f32.xlu0 %v201_v9 }
 0x12c   : > { %v203_v11 = vpop.xlane.xlu0 %202 }
 0x12d   : > { %208 = vst.msk [vmem:[%s174_s9] sm:$0xff] %vm207_vm3, %v203_v11 }
 0x12e   : > { %362 = shalt.err (!%p359_p3)
}
 0x12f   : > { %s363_s28 = scalar_lea.hbm %s500_s20, 128  ;;  %s367_s4 = scalar_lea.hbm %s545_s3, 384 }
 0x130   : > { %p364_p4 = scmp.ne.s32.totalorder %s500_s20, %s363_s28  ;;  %p368_p9 = scmp.lt.u32.totalorder %s500_s20, %s545_s3 }
 0x131   : > { %p369_p10 = scmp.lt.u32.totalorder %s367_s4, %s363_s28  ;;  %p371_p12 = scmp.lt.u32.totalorder %s363_s28, %s500_s20 }
 0x132   : > { %p365_p7 = pnand %p364_p4, %p474_p5 }
 0x133   : > { %p370_p11 = por %p369_p10, %p368_p9 }
 0x134   : > { %p366_p8 = pneg %p365_p7 }
 0x135   : > { %p372_p13 = por %p371_p12, %p370_p11 }
 0x137   : > { %p373_p0 = pnand %p372_p13, %p366_p8 }
 0x139   : > { %376 = shalt.err (!%p373_p0)
}
 0x13a   : > { %307 = dma.vmem_to_hbm [thread:$0]  (%p474_p5), %s502_s11, 128, %s500_s20, %s210_s24  }
 0x13b PF: > { %p313_p1 = scmp.ge.s32.totalorder %s411_s15, 2  ;;  %s235_s7 = sand.u32 1, %s399_s12  }
 0x13c   : > { %s236_s8 = scalar_lea.sflag [#allocation3], %s235_s7 }
 0x13d   : > { %p310_p2 = pnand %p313_p1, %p478_p6 }
 0x13f   : > { %394 = dma.done.wait (!%p310_p2), %s236_s8, 128  }
 0x140   : > { %396 = vsyncadd (!%p310_p2), %s236_s8, 4294967168  ;;  %p13_p3 = scmp.ge.s32.totalorder %s461_s18, 5   ;;  %s548_s12 = smov %s403_s13 }
 0x141   : > { %s549_s13 = smov %s407_s14  ;;  %s550_s14 = smov %s472_s21 }
 0x142   : > { %s551_s15 = smov %s461_s18  ;;  %15 = sbr.rel (!%p13_p3) target bundleno = 3 (0x3), region = 70 }
 0x149   :  { %241 = vsyncpa [#allocation3], 1 }
 0x14a   :  { %243 = vsyncpa [#allocation3 + $0x1], 1 }

</bundles_post_ra>
